<compile_context>
chip_gen: v6e
topology: v6e:2x2x1
jax: 0.10.0
libtpu: 0.0.40
codegen_flags: <defaults>
</compile_context>

<pallas_src>
import functools

import jax
import jax.numpy as jnp
import numpy as np
from jax.experimental import pallas as pl
from jax.experimental.pallas import tpu as pltpu


def _round_up(v, m):
    return ((v + m - 1) // m) * m


# ----------------------------------------------------------------------------
# Stage 1: stacked FC1 -> ReLU -> FC2 embedding over all (x and ref) rows.
# grid = (row_tiles, k_tiles); K axis accumulates into an f32 VMEM scratch.
# ----------------------------------------------------------------------------
def _emb_kernel(f_ref, w0_ref, b0_ref, w1_ref, b1_ref, e_ref, acc_ref):
    k = pl.program_id(1)

    @pl.when(k == 0)
    def _():
        acc_ref[...] = jnp.zeros_like(acc_ref)

    # bf16 x bf16 -> f32 accumulate (MXU-native path on v5e/v6e/v7x).
    acc_ref[...] += jnp.dot(f_ref[...], w0_ref[...],
                            preferred_element_type=jnp.float32)

    @pl.when(k == pl.num_programs(1) - 1)
    def _():
        h = jnp.maximum(acc_ref[...] + b0_ref[...], 0.0).astype(jnp.bfloat16)
        e = jnp.dot(h, w1_ref[...],
                    preferred_element_type=jnp.float32) + b1_ref[...]
        e_ref[...] = e.astype(e_ref.dtype)


def _embed(feats, w0t, b0, w1t, b1, *, TR, TK):
    ROWS_P, d_pad = feats.shape
    F_pad = w0t.shape[1]
    grid = (ROWS_P // TR, d_pad // TK)

    # rough double-buffered VMEM estimate -> scoped limit with headroom
    est = (2 * TR * TK * 2 + 2 * TK * F_pad * 2 + 2 * F_pad * F_pad * 2 +
           2 * TR * F_pad * 2 + TR * F_pad * 4 + 4 * F_pad * 4)
    vmem_limit = int(min(max(2 * est, 32 * 1024 * 1024), 48 * 1024 * 1024))

    flops = 2 * ROWS_P * d_pad * F_pad + 2 * ROWS_P * F_pad * F_pad
    bytes_accessed = (feats.size * 2 + w0t.size * 2 + w1t.size * 2 +
                      ROWS_P * F_pad * 2 + 4 * F_pad * 4)

    return pl.pallas_call(
        _emb_kernel,
        out_shape=jax.ShapeDtypeStruct((ROWS_P, F_pad), jnp.bfloat16),
        grid_spec=pltpu.PrefetchScalarGridSpec(
            num_scalar_prefetch=0,
            grid=grid,
            in_specs=[
                pl.BlockSpec((TR, TK), lambda r, k: (r, k)),        # feats tile
                pl.BlockSpec((TK, F_pad), lambda r, k: (k, 0)),     # w0t K-tile
                pl.BlockSpec((1, F_pad), lambda r, k: (0, 0)),      # b0
                pl.BlockSpec((F_pad, F_pad), lambda r, k: (0, 0)),  # w1t (const)
                pl.BlockSpec((1, F_pad), lambda r, k: (0, 0)),      # b1
            ],
            out_specs=pl.BlockSpec((TR, F_pad), lambda r, k: (r, 0)),
            scratch_shapes=[pltpu.VMEM((TR, F_pad), jnp.float32)],
        ),
        compiler_params=pltpu.CompilerParams(
            dimension_semantics=("parallel", "arbitrary"),
            vmem_limit_bytes=vmem_limit),
        cost_estimate=pl.CostEstimate(flops=flops, transcendentals=0,
                                      bytes_accessed=bytes_accessed),
    )(feats, w0t, b0, w1t, b1)


# ----------------------------------------------------------------------------
# Stage 2: per-split cross products. Compact ref rows (KREFP) are masked and
# copied into a zero (KP, F) VMEM scratch so the output tile (MPX, KP) stays
# lane-dense and is written with a single unmasked full-tile store. Column 0
# (the dummy row of each ref block) is exactly zero.
# ----------------------------------------------------------------------------
def _match_kernel(xe_ref, re_ref, mask_ref, o_ref, pad_ref, *, KREFP):
    pad_ref[...] = jnp.zeros_like(pad_ref)
    # mask only the ref block (dummy + padding rows -> zero embeddings)
    pad_ref[0:KREFP, :] = (re_ref[...] * mask_ref[...]).astype(pad_ref.dtype)
    prod = jax.lax.dot_general(
        xe_ref[...], pad_ref[...], (((1,), (1,)), ((), ())),
        preferred_element_type=jnp.float32)                 # (MPX, KP)
    o_ref[0] = prod.astype(o_ref.dtype)


def _match(xe, re, mask, *, n, MPX, KREFP, KP):
    F_pad = xe.shape[1]
    est = (2 * (MPX * F_pad * 2 + KREFP * F_pad * 2 + KREFP * 128 * 4 +
                MPX * KP * 4) + KP * F_pad * 2)
    vmem_limit = int(min(max(2 * est, 32 * 1024 * 1024), 48 * 1024 * 1024))
    kernel = functools.partial(_match_kernel, KREFP=KREFP)
    return pl.pallas_call(
        kernel,
        out_shape=jax.ShapeDtypeStruct((n, MPX, KP), jnp.float32),
        grid_spec=pltpu.PrefetchScalarGridSpec(
            num_scalar_prefetch=0,
            grid=(n,),
            in_specs=[
                pl.BlockSpec((MPX, F_pad), lambda i: (i, 0)),
                pl.BlockSpec((KREFP, F_pad), lambda i: (i, 0)),
                pl.BlockSpec((KREFP, 1), lambda i: (i, 0)),
            ],
            out_specs=pl.BlockSpec((1, MPX, KP), lambda i: (i, 0, 0)),
            scratch_shapes=[pltpu.VMEM((KP, F_pad), jnp.bfloat16)],
        ),
        compiler_params=pltpu.CompilerParams(
            dimension_semantics=("arbitrary",),
            vmem_limit_bytes=vmem_limit),
    )(xe, re, mask)


# ----------------------------------------------------------------------------
# Full forward (layout + both kernels) under jit with static split sizes.
# ----------------------------------------------------------------------------
@functools.partial(jax.jit,
                   static_argnames=("x_n", "ref_x_n", "d_in", "TK", "d_pad"))
def _track_head_forward(x, ref_x, w0t, b0, w1t, b1, *,
                        x_n, ref_x_n, d_in, TK, d_pad):
    n = len(x_n)
    MPX = _round_up(max(max(x_n), 1), 16)            # bf16 sublane alignment
    KREFP = _round_up(max(ref_x_n) + 1, 16)          # compact ref rows (+dummy)
    KP = _round_up(max(ref_x_n) + 1, 128)            # lane-dense score width

    x2 = x.reshape(x.shape[0], -1).astype(jnp.bfloat16)
    r2 = ref_x.reshape(ref_x.shape[0], -1).astype(jnp.bfloat16)

    # One concatenate of pre-padded per-split blocks (fused under jit);
    # ref blocks get a leading all-zero dummy row.
    blocks = []
    ox = 0
    for m in x_n:
        blocks.append(jnp.pad(x2[ox:ox + m],
                              ((0, MPX - m), (0, d_pad - d_in))))
        ox += m
    orx = 0
    for k in ref_x_n:
        blocks.append(jnp.pad(r2[orx:orx + k],
                              ((1, KREFP - k - 1), (0, d_pad - d_in))))
        orx += k
    feats = jnp.concatenate(blocks, axis=0)
    ROWS = n * (MPX + KREFP)

    # Row tile: big tiles at realistic sizes; >=2 tiles at toy sizes so the
    # pipelined grid / accumulator paths are exercised.
    if ROWS >= 512:
        TR = 256
    elif ROWS >= 32:
        TR = _round_up(ROWS // 2, 16)
    else:
        TR = ROWS
    ROWS_P = _round_up(ROWS, TR)
    if ROWS_P != ROWS:
        feats = jnp.pad(feats, ((0, ROWS_P - ROWS), (0, 0)))

    e = _embed(feats, w0t, b0, w1t, b1, TR=TR, TK=TK)
    xe = e[:n * MPX]
    re = e[n * MPX: n * (MPX + KREFP)]

    # ref-row validity mask (compile-time constant): zero for the dummy row
    # and padding rows so score column 0 is exactly zero for any weights.
    mask_np = np.zeros((n * KREFP, 1), np.float32)
    for i, k in enumerate(ref_x_n):
        mask_np[i * KREFP + 1: i * KREFP + 1 + k] = 1.0
    mask = jnp.asarray(mask_np)

    out = _match(xe, re, mask, n=n, MPX=MPX, KREFP=KREFP, KP=KP)

    # Slice the padded (n, MPX, KP) slab to the module's per-split (m, k+1).
    return tuple(out[i, :m, :k + 1]
                 for i, (m, k) in enumerate(zip(x_n, ref_x_n)))


# ----------------------------------------------------------------------------
# TrackHead (Pallas): mirrors TrackHead.__init__ / forward semantics.
# ----------------------------------------------------------------------------
class TrackHeadPallas:
    def __init__(self, key, in_channels, roi_feat_size, fc_out_channels,
                 num_fcs=2):
        assert num_fcs == 2, "kernel implements the default 2-FC head"
        self.d_in = in_channels * roi_feat_size * roi_feat_size
        self.fc_out = fc_out_channels
        k0, k1 = jax.random.split(key)
        # nn.init.normal_(weight, 0, 0.01); bias = 0.  Stored pre-transposed.
        w0 = 0.01 * jax.random.normal(k0, (self.d_in, fc_out_channels),
                                      jnp.float32)
        w1 = 0.01 * jax.random.normal(k1, (fc_out_channels, fc_out_channels),
                                      jnp.float32)
        self.w0t_f32, self.w1t_f32 = w0, w1
        self.b0_f32 = jnp.zeros((1, fc_out_channels), jnp.float32)
        self.b1_f32 = jnp.zeros((1, fc_out_channels), jnp.float32)

        # Kernel-side padded bf16 parameters; zero padding is numerically inert.
        base = _round_up(self.d_in, 128)
        self.TK = 512 if base >= 1024 else 128
        self.d_pad = _round_up(self.d_in, self.TK)
        self.F_pad = _round_up(fc_out_channels, 128)
        fpad = self.F_pad - fc_out_channels
        self.w0t = jnp.pad(w0, ((0, self.d_pad - self.d_in),
                                (0, fpad))).astype(jnp.bfloat16)
        self.w1t = jnp.pad(w1, ((0, fpad), (0, fpad))).astype(jnp.bfloat16)
        self.b0 = jnp.pad(self.b0_f32, ((0, 0), (0, fpad)))
        self.b1 = jnp.pad(self.b1_f32, ((0, 0), (0, fpad)))

    def __call__(self, x, ref_x, x_n, ref_x_n):
        assert len(x_n) == len(ref_x_n) and len(x_n) >= 1
        assert x.shape[0] == sum(x_n) and ref_x.shape[0] == sum(ref_x_n)
        return _track_head_forward(
            x, ref_x, self.w0t, self.b0, self.w1t, self.b1,
            x_n=tuple(int(v) for v in x_n),
            ref_x_n=tuple(int(v) for v in ref_x_n),
            d_in=self.d_in, TK=self.TK, d_pad=self.d_pad)


# ----------------------------------------------------------------------------
# References for the self-test.
# ----------------------------------------------------------------------------
def track_head_ref_f32(head, x, ref_x, x_n, ref_x_n):
    x2 = x.reshape(x.shape[0], -1).astype(jnp.float32)
    r2 = ref_x.reshape(ref_x.shape[0], -1).astype(jnp.float32)

    def emb(v):
        h = jnp.maximum(v @ head.w0t_f32 + head.b0_f32, 0.0)
        return h @ head.w1t_f32 + head.b1_f32

    xe, re = emb(x2), emb(r2)
    out, ox, orx = [], 0, 0
    for m, k in zip(x_n, ref_x_n):
        prod = xe[ox:ox + m] @ re[orx:orx + k].T
        out.append(jnp.concatenate([jnp.zeros((m, 1), jnp.float32), prod], 1))
        ox += m
        orx += k
    return out


def track_head_ref_bf16(head, x, ref_x, x_n, ref_x_n):
    # Same bf16-operand / f32-accumulate math as the kernel.
    w0 = head.w0t_f32.astype(jnp.bfloat16)
    w1 = head.w1t_f32.astype(jnp.bfloat16)
    x2 = x.reshape(x.shape[0], -1).astype(jnp.bfloat16)
    r2 = ref_x.reshape(ref_x.shape[0], -1).astype(jnp.bfloat16)

    def emb(v):
        h = jnp.dot(v, w0, preferred_element_type=jnp.float32) + head.b0_f32
        h = jnp.maximum(h, 0.0).astype(jnp.bfloat16)
        e = jnp.dot(h, w1, preferred_element_type=jnp.float32) + head.b1_f32
        return e.astype(jnp.bfloat16)

    xe, re = emb(x2), emb(r2)
    out, ox, orx = [], 0, 0
    for m, k in zip(x_n, ref_x_n):
        prod = jnp.dot(xe[ox:ox + m], re[orx:orx + k].T,
                       preferred_element_type=jnp.float32)
        out.append(jnp.concatenate([jnp.zeros((m, 1), jnp.float32), prod], 1))
        ox += m
        orx += k
    return out


if __name__ == "__main__":
    key = jax.random.PRNGKey(0)
    k_param, k_x, k_r = jax.random.split(key, 3)

    # small, module-consistent shapes:
    #   roi features: (num_rois, in_channels, roi_feat_size, roi_feat_size)
    in_channels, roi_feat_size, fc_out = 4, 8, 128
    x_n = [4, 2]        # detections per image, frame 1
    ref_x_n = [3, 2]    # detections per image, frame 0

    roi_feats1 = jax.random.normal(
        k_x, (sum(x_n), in_channels, roi_feat_size, roi_feat_size), jnp.float32)
    roi_feats0 = jax.random.normal(
        k_r, (sum(ref_x_n), in_channels, roi_feat_size, roi_feat_size),
        jnp.float32)

    head = TrackHeadPallas(k_param, in_channels, roi_feat_size, fc_out,
                           num_fcs=2)

    scores = head(roi_feats1, roi_feats0, x_n, ref_x_n)
    scores = [jax.block_until_ready(s) for s in scores]

    refs16 = track_head_ref_bf16(head, roi_feats1, roi_feats0, x_n, ref_x_n)
    refs32 = track_head_ref_f32(head, roi_feats1, roi_feats0, x_n, ref_x_n)
    for s, r16, r32, m, k in zip(scores, refs16, refs32, x_n, ref_x_n):
        assert s.shape == (m, k + 1), s.shape
        s_np = np.asarray(s)
        # dummy column is exactly zero
        np.testing.assert_allclose(s_np[:, 0], 0.0)
        # tight check vs bf16-matched math
        np.testing.assert_allclose(s_np, np.asarray(r16), rtol=1e-2, atol=2e-5)
        # loose check vs true f32 module math (bf16 MXU operands)
        np.testing.assert_allclose(s_np, np.asarray(r32), rtol=5e-2, atol=5e-4)

    print("KERNEL_OK")
</pallas_src>

<mosaic_0001>
module attributes {stable_mosaic.version = 11 : i64} {
  func.func @_emb_kernel(%arg0: i32, %arg1: i32, %arg2: memref<32x128xbf16, #tpu.memory_space<vmem>>, %arg3: memref<128x128xbf16, #tpu.memory_space<vmem>>, %arg4: memref<1x128xf32, #tpu.memory_space<vmem>>, %arg5: memref<128x128xbf16, #tpu.memory_space<vmem>>, %arg6: memref<1x128xf32, #tpu.memory_space<vmem>>, %arg7: memref<32x128xbf16, #tpu.memory_space<vmem>>, %arg8: memref<32x128xf32, #tpu.memory_space<vmem>>) attributes {dimension_semantics = [#tpu.dimension_semantics<parallel>, #tpu.dimension_semantics<arbitrary>], iteration_bounds = array<i64: 2, 2>, scalar_prefetch = 0 : i64, scratch_operands = 1 : i64, tpu.core_type = #tpu.core_type<tc>, window_params = [{transform_indices = @transform_0, window_bounds = array<i64: 32, 128>}, {transform_indices = @transform_1, window_bounds = array<i64: 128, 128>}, {pipeline_mode = #tpu.pipeline_mode<synchronous>, transform_indices = @transform_2, window_bounds = array<i64: 1, 128>}, {pipeline_mode = #tpu.pipeline_mode<synchronous>, transform_indices = @transform_3, window_bounds = array<i64: 128, 128>}, {pipeline_mode = #tpu.pipeline_mode<synchronous>, transform_indices = @transform_4, window_bounds = array<i64: 1, 128>}, {transform_indices = @transform_5, window_bounds = array<i64: 32, 128>}]} {
    %c0_i32 = arith.constant 0 : i32
    %0 = arith.cmpi eq, %arg1, %c0_i32 : i32
    %1 = arith.extui %0 : i1 to i32
    %c0_i32_0 = arith.constant 0 : i32
    %2 = arith.cmpi ne, %1, %c0_i32_0 : i32
    scf.if %2 {
      %cst_9 = arith.constant 0.000000e+00 : f32
      %12 = vector.broadcast %cst_9 : f32 to vector<32x128xf32>
      %c0_10 = arith.constant 0 : index
      %c0_11 = arith.constant 0 : index
      %13 = vector.load %arg8[%c0_10, %c0_11] : memref<32x128xf32, #tpu.memory_space<vmem>>, vector<32x128xf32>
      tpu.vector_store %arg8[%c0_10, %c0_11], %12 {strides = array<i32>} : memref<32x128xf32, #tpu.memory_space<vmem>>, vector<32x128xf32>,
    } else {
    }
    %c0 = arith.constant 0 : index
    %c0_1 = arith.constant 0 : index
    %3 = vector.load %arg8[%c0, %c0_1] : memref<32x128xf32, #tpu.memory_space<vmem>>, vector<32x128xf32>
    %c0_2 = arith.constant 0 : index
    %c0_3 = arith.constant 0 : index
    %4 = vector.load %arg2[%c0_2, %c0_3] : memref<32x128xbf16, #tpu.memory_space<vmem>>, vector<32x128xbf16>
    %c0_4 = arith.constant 0 : index
    %c0_5 = arith.constant 0 : index
    %5 = vector.load %arg3[%c0_4, %c0_5] : memref<128x128xbf16, #tpu.memory_space<vmem>>, vector<128x128xbf16>
    %cst = arith.constant dense<0.000000e+00> : vector<32x128xf32>
    %6 = tpu.matmul %4, %5, %cst {dimension_numbers = #tpu.dot_dimension_numbers<[1], [0], [0], [1], [0, 0, 1, 1], [], []>} : vector<32x128xbf16>, vector<128x128xbf16>, vector<32x128xf32> -> vector<32x128xf32>
    %7 = arith.addf %3, %6 : vector<32x128xf32>
    %c0_6 = arith.constant 0 : index
    %c0_7 = arith.constant 0 : index
    %8 = vector.load %arg8[%c0_6, %c0_7] : memref<32x128xf32, #tpu.memory_space<vmem>>, vector<32x128xf32>
    tpu.vector_store %arg8[%c0_6, %c0_7], %7 {strides = array<i32>} : memref<32x128xf32, #tpu.memory_space<vmem>>, vector<32x128xf32>,
    %c1_i32 = arith.constant 1 : i32
    %9 = arith.cmpi eq, %arg1, %c1_i32 : i32
    %10 = arith.extui %9 : i1 to i32
    %c0_i32_8 = arith.constant 0 : i32
    %11 = arith.cmpi ne, %10, %c0_i32_8 : i32
    scf.if %11 {
      %c0_9 = arith.constant 0 : index
      %c0_10 = arith.constant 0 : index
      %12 = vector.load %arg8[%c0_9, %c0_10] : memref<32x128xf32, #tpu.memory_space<vmem>>, vector<32x128xf32>
      %c0_11 = arith.constant 0 : index
      %c0_12 = arith.constant 0 : index
      %13 = vector.load %arg4[%c0_11, %c0_12] : memref<1x128xf32, #tpu.memory_space<vmem>>, vector<1x128xf32>
      %14 = vector.broadcast %13 : vector<1x128xf32> to vector<32x128xf32>
      %15 = arith.addf %12, %14 : vector<32x128xf32>
      %cst_13 = arith.constant 0.000000e+00 : f32
      %16 = vector.broadcast %cst_13 : f32 to vector<32x128xf32>
      %17 = arith.maximumf %15, %16 : vector<32x128xf32>
      %18 = arith.truncf %17 : vector<32x128xf32> to vector<32x128xbf16>
      %c0_14 = arith.constant 0 : index
      %c0_15 = arith.constant 0 : index
      %19 = vector.load %arg5[%c0_14, %c0_15] : memref<128x128xbf16, #tpu.memory_space<vmem>>, vector<128x128xbf16>
      %cst_16 = arith.constant dense<0.000000e+00> : vector<32x128xf32>
      %20 = tpu.matmul %18, %19, %cst_16 {dimension_numbers = #tpu.dot_dimension_numbers<[1], [0], [0], [1], [0, 0, 1, 1], [], []>} : vector<32x128xbf16>, vector<128x128xbf16>, vector<32x128xf32> -> vector<32x128xf32>
      %c0_17 = arith.constant 0 : index
      %c0_18 = arith.constant 0 : index
      %21 = vector.load %arg6[%c0_17, %c0_18] : memref<1x128xf32, #tpu.memory_space<vmem>>, vector<1x128xf32>
      %22 = vector.broadcast %21 : vector<1x128xf32> to vector<32x128xf32>
      %23 = arith.addf %20, %22 : vector<32x128xf32>
      %24 = arith.truncf %23 : vector<32x128xf32> to vector<32x128xbf16>
      %c0_19 = arith.constant 0 : index
      %c0_20 = arith.constant 0 : index
      %25 = vector.load %arg7[%c0_19, %c0_20] : memref<32x128xbf16, #tpu.memory_space<vmem>>, vector<32x128xbf16>
      tpu.vector_store %arg7[%c0_19, %c0_20], %24 {strides = array<i32>} : memref<32x128xbf16, #tpu.memory_space<vmem>>, vector<32x128xbf16>,
    } else {
    }
    return
  }
  func.func @transform_0(%arg0: i32, %arg1: i32) -> (i32, i32) {
    %c0_i32 = arith.constant 0 : i32
    return %arg0, %arg1 : i32, i32
  }
  func.func @transform_1(%arg0: i32, %arg1: i32) -> (i32, i32) {
    %c0_i32 = arith.constant 0 : i32
    %c0_i32_0 = arith.constant 0 : i32
    return %arg1, %c0_i32 : i32, i32
  }
  func.func @transform_2(%arg0: i32, %arg1: i32) -> (i32, i32) {
    %c0_i32 = arith.constant 0 : i32
    %c0_i32_0 = arith.constant 0 : i32
    %c0_i32_1 = arith.constant 0 : i32
    return %c0_i32, %c0_i32_0 : i32, i32
  }
  func.func @transform_3(%arg0: i32, %arg1: i32) -> (i32, i32) {
    %c0_i32 = arith.constant 0 : i32
    %c0_i32_0 = arith.constant 0 : i32
    %c0_i32_1 = arith.constant 0 : i32
    return %c0_i32, %c0_i32_0 : i32, i32
  }
  func.func @transform_4(%arg0: i32, %arg1: i32) -> (i32, i32) {
    %c0_i32 = arith.constant 0 : i32
    %c0_i32_0 = arith.constant 0 : i32
    %c0_i32_1 = arith.constant 0 : i32
    return %c0_i32, %c0_i32_0 : i32, i32
  }
  func.func @transform_5(%arg0: i32, %arg1: i32) -> (i32, i32) {
    %c0_i32 = arith.constant 0 : i32
    %c0_i32_0 = arith.constant 0 : i32
    return %arg0, %c0_i32 : i32, i32
  }
}

module attributes {stable_mosaic.version = 11 : i64} {
  func.func @_match_kernel(%arg0: i32, %arg1: memref<16x128xbf16, #tpu.memory_space<vmem>>, %arg2: memref<16x128xbf16, #tpu.memory_space<vmem>>, %arg3: memref<16x1xf32, #tpu.memory_space<vmem>>, %arg4: memref<1x16x128xf32, #tpu.memory_space<vmem>>, %arg5: memref<128x128xbf16, #tpu.memory_space<vmem>>) attributes {dimension_semantics = [#tpu.dimension_semantics<arbitrary>], iteration_bounds = array<i64: 2>, scalar_prefetch = 0 : i64, scratch_operands = 1 : i64, tpu.core_type = #tpu.core_type<tc>, window_params = [{transform_indices = @transform_0, window_bounds = array<i64: 16, 128>}, {transform_indices = @transform_1, window_bounds = array<i64: 16, 128>}, {transform_indices = @transform_2, window_bounds = array<i64: 16, 1>}, {transform_indices = @transform_3, window_bounds = array<i64: 1, 16, 128>}]} {
    %cst = arith.constant 0.000000e+00 : bf16
    %0 = vector.broadcast %cst : bf16 to vector<128x128xbf16>
    %c0 = arith.constant 0 : index
    %c0_0 = arith.constant 0 : index
    %1 = vector.load %arg5[%c0, %c0_0] : memref<128x128xbf16, #tpu.memory_space<vmem>>, vector<128x128xbf16>
    tpu.vector_store %arg5[%c0, %c0_0], %0 {strides = array<i32>} : memref<128x128xbf16, #tpu.memory_space<vmem>>, vector<128x128xbf16>,
    %c0_1 = arith.constant 0 : index
    %c0_2 = arith.constant 0 : index
    %2 = vector.load %arg2[%c0_1, %c0_2] : memref<16x128xbf16, #tpu.memory_space<vmem>>, vector<16x128xbf16>
    %c0_3 = arith.constant 0 : index
    %c0_4 = arith.constant 0 : index
    %3 = vector.load %arg3[%c0_3, %c0_4] : memref<16x1xf32, #tpu.memory_space<vmem>>, vector<16x1xf32>
    %4 = arith.extf %2 : vector<16x128xbf16> to vector<16x128xf32>
    %5 = vector.broadcast %3 : vector<16x1xf32> to vector<16x128xf32>
    %6 = arith.mulf %4, %5 : vector<16x128xf32>
    %7 = arith.truncf %6 : vector<16x128xf32> to vector<16x128xbf16>
    %c0_5 = arith.constant 0 : index
    %c0_6 = arith.constant 0 : index
    %8 = vector.load %arg5[%c0_5, %c0_6] : memref<128x128xbf16, #tpu.memory_space<vmem>>, vector<16x128xbf16>
    tpu.vector_store %arg5[%c0_5, %c0_6], %7 {strides = array<i32>} : memref<128x128xbf16, #tpu.memory_space<vmem>>, vector<16x128xbf16>,
    %c0_7 = arith.constant 0 : index
    %c0_8 = arith.constant 0 : index
    %9 = vector.load %arg1[%c0_7, %c0_8] : memref<16x128xbf16, #tpu.memory_space<vmem>>, vector<16x128xbf16>
    %c0_9 = arith.constant 0 : index
    %c0_10 = arith.constant 0 : index
    %10 = vector.load %arg5[%c0_9, %c0_10] : memref<128x128xbf16, #tpu.memory_space<vmem>>, vector<128x128xbf16>
    %cst_11 = arith.constant dense<0.000000e+00> : vector<16x128xf32>
    %11 = tpu.matmul %9, %10, %cst_11 {dimension_numbers = #tpu.dot_dimension_numbers<[1], [1], [0], [0], [0, 0, 1, 0], [], []>} : vector<16x128xbf16>, vector<128x128xbf16>, vector<16x128xf32> -> vector<16x128xf32>
    %c0_12 = arith.constant 0 : index
    %c0_13 = arith.constant 0 : index
    %c0_14 = arith.constant 0 : index
    %12 = vector.load %arg4[%c0_12, %c0_13, %c0_14] : memref<1x16x128xf32, #tpu.memory_space<vmem>>, vector<1x16x128xf32>
    %13 = vector.shape_cast %12 : vector<1x16x128xf32> to vector<16x128xf32>
    %14 = vector.shape_cast %11 : vector<16x128xf32> to vector<1x16x128xf32>
    tpu.vector_store %arg4[%c0_12, %c0_13, %c0_14], %14 {strides = array<i32>} : memref<1x16x128xf32, #tpu.memory_space<vmem>>, vector<1x16x128xf32>,
    return
  }
  func.func @transform_0(%arg0: i32) -> (i32, i32) {
    %c0_i32 = arith.constant 0 : i32
    %c0_i32_0 = arith.constant 0 : i32
    return %arg0, %c0_i32 : i32, i32
  }
  func.func @transform_1(%arg0: i32) -> (i32, i32) {
    %c0_i32 = arith.constant 0 : i32
    %c0_i32_0 = arith.constant 0 : i32
    return %arg0, %c0_i32 : i32, i32
  }
  func.func @transform_2(%arg0: i32) -> (i32, i32) {
    %c0_i32 = arith.constant 0 : i32
    %c0_i32_0 = arith.constant 0 : i32
    return %arg0, %c0_i32 : i32, i32
  }
  func.func @transform_3(%arg0: i32) -> (i32, i32, i32) {
    %c0_i32 = arith.constant 0 : i32
    %c0_i32_0 = arith.constant 0 : i32
    %c0_i32_1 = arith.constant 0 : i32
    return %arg0, %c0_i32, %c0_i32_0 : i32, i32, i32
  }
}

</mosaic_0001>

<bundles_post_ra>
// kernel: _track_head_forward.3
= control target key start
LH: loop header
LB: loop body
LE: loop exit
PB: predicated region body
PF: predicated region fallthrough
CT: control target
= control target key end

     0   :  { %s575_s12 = smov 0   ;;  %s614_s0 = inlined_call_operand.vmem [shape: bf16[32,128], index: 0, kind: input, shape index: {}]   ;;  %s615_s1 = inlined_call_operand.vmem [shape: bf16[32,128], index: 1, kind: input, shape index: {}]   ;;  %s616_s2 = inlined_call_operand.vmem [shape: f32[32,1], index: 2, kind: input, shape index: {}]   ;;  %s617_s3 = inlined_call_operand.vmem [shape: f32[2,16,128], index: 3, kind: output, shape index: {}]  }
   0x1 LB: > { %s581_s13 = sadd.s32 4294967295, %s550_s12   ;;  %p460_p0 = scmp.ge.s32.totalorder %s550_s12, 1  ;;  %s550_s12 = sphi %s575_s12, %s13_s12  }
   0x2   : > { %p160_p1 = scmp.lt.s32.totalorder %s550_s12, 3 }
   0x4   : > { %p161_p2 = pnand %p460_p0, %p160_p1 }
   0x5   : > { %s461_s14 = sshll.u32 (!%p161_p2), %s581_s13, 1  ;;  %p212_p4 = scmp.lt.s32.totalorder (!%p161_p2), %s581_s13, 1 }
   0x6   : > { %164 = sbr.rel (%p161_p2) target bundleno = 361 (0x169), region = 32  ;;  %p195_p3 = scmp.lt.s32.totalorder (!%p161_p2), %s461_s14, 3 }
   0xb   : > { %v552_v0 = vmov 0   ;;  %v553_v1 = vmov 0.0   ;;  %s619_s14 = smov (!%p195_p3, %s461_s14), 3  ;;  %vm554_vm0 = vmmov 0   ;;  %s621_s13 = smov (!%p212_p4, %s581_s13), 1 }
   0xc   : > { %534 = vset.pattern.permute.xlu0 %v552_v0  ;;  %218 = vst [vmem:[#allocation2] sm:$0xf] %v552_v0  ;;  %219 = vst [vmem:[#allocation2 + $0x4] sm:$0xf] %v552_v0  ;;  %503 = vmatprep.subr.bf16.mxu0 %v553_v1  ;;  %s466_s15 = sshll.u32 %s619_s14, 3  ;;  %s462_s16 = sshll.u32 %s619_s14, 2 }
   0xd   : > { %220 = vst [vmem:[#allocation2 + $0x8] sm:$0xf] %v552_v0  ;;  %221 = vst [vmem:[#allocation2 + $0xc] sm:$0xf] %v552_v0  ;;  %s210_s19 = scalar_lea.vmem %s616_s2, %s466_s15  ;;  %s598_s22 = scalar_lea.vmem %s614_s0, %s462_s16  ;;  %519 = vmatprep.mubr.msk.bf16.mxu0 %vm554_vm0, %v553_v1 }
   0xe   : > { %222 = vst [vmem:[#allocation2 + $0x10] sm:$0xf] %v552_v0  ;;  %223 = vst [vmem:[#allocation2 + $0x14] sm:$0xf] %v552_v0  ;;  %v236_v2 = vld [vmem:[%s210_s19] sm:$0xff]  ;;  %v237_v4 = vld [vmem:[%s210_s19 + $0x8] sm:$0xff]  ;;  %s204_s25 = scalar_lea.vmem %s615_s1, %s462_s16 }
   0xf   : > { %224 = vst [vmem:[#allocation2 + $0x18] sm:$0xf] %v552_v0  ;;  %225 = vst [vmem:[#allocation2 + $0x1c] sm:$0xf] %v552_v0  ;;  %242 = vperm.xlu0 %534, %v236_v2   ;;  %v486_v11 = vld [vmem:[%s204_s25] sm:$0xff]   ;;  %s482_s26 = sshll.u32 %s621_s13, 4 }
  0x10   : > { %226 = vst [vmem:[#allocation2 + $0x20] sm:$0xf] %v552_v0  ;;  %227 = vst [vmem:[#allocation2 + $0x24] sm:$0xf] %v552_v0  ;;  %v487_v13 = vunpack.c.l.bf16 %v486_v11  ;;  %v488_v14 = vunpack.c.h.bf16 %v486_v11  ;;  %v543_v20 = vld [vmem:[%s598_s22] sm:$0xff]   ;;  %s216_s29 = scalar_lea.vmem %s617_s3, %s482_s26 }
  0x11   : > { %228 = vst [vmem:[#allocation2 + $0x28] sm:$0xf] %v552_v0  ;;  %229 = vst [vmem:[#allocation2 + $0x2c] sm:$0xf] %v552_v0 }
  0x12   : > { %230 = vst [vmem:[#allocation2 + $0x30] sm:$0xf] %v552_v0  ;;  %231 = vst [vmem:[#allocation2 + $0x34] sm:$0xf] %v552_v0 }
  0x13   : > { %232 = vst [vmem:[#allocation2 + $0x38] sm:$0xf] %v552_v0  ;;  %233 = vst [vmem:[#allocation2 + $0x3c] sm:$0xf] %v552_v0  ;;  %247 = vperm.xlu0 %534, %v237_v4  }
  0x14   : > { %v541_v10 = vld [vmem:[#allocation2 + $0x8] sm:$0xff]  }
  0x15   : > { %v540_v9 = vld [vmem:[#allocation2 + $0x10] sm:$0xff]  }
  0x16   : > { %v539_v8 = vld [vmem:[#allocation2 + $0x18] sm:$0xff]  }
  0x17   : > { %v538_v7 = vld [vmem:[#allocation2 + $0x20] sm:$0xff]  }
  0x18   : > { %v537_v6 = vld [vmem:[#allocation2 + $0x28] sm:$0xff]  }
  0x19   : > { %v536_v5 = vld [vmem:[#allocation2 + $0x30] sm:$0xff]  }
  0x1a   : > { %v535_v3 = vld [vmem:[#allocation2 + $0x38] sm:$0xff]  }
  0x1b   : > { %504 = vmatpush3.bf16.xpose.msra.mxu0 %v535_v3 }
  0x1c   : > { %505 = vmatprep.subr.bf16.mxu0 %v553_v1 }
  0x23   : > { %506 = vmatpush3.bf16.xpose.msra.mxu0 %v536_v5 }
  0x24   : > { %507 = vmatprep.subr.bf16.mxu0 %v553_v1 }
  0x2b   : > { %508 = vmatpush3.bf16.xpose.msra.mxu0 %v537_v6 }
  0x2c   : > { %509 = vmatprep.subr.bf16.mxu0 %v553_v1 }
  0x33   : > { %510 = vmatpush3.bf16.xpose.msra.mxu0 %v538_v7 }
  0x34   : > { %511 = vmatprep.subr.bf16.mxu0 %v553_v1 }
  0x3b   : > { %512 = vmatpush3.bf16.xpose.msra.mxu0 %v539_v8 }
  0x3c   : > { %513 = vmatprep.subr.bf16.mxu0 %v553_v1 }
  0x43   : > { %514 = vmatpush3.bf16.xpose.msra.mxu0 %v540_v9 }
  0x44   : > { %515 = vmatprep.subr.bf16.mxu0 %v553_v1 }
  0x4b   : > { %516 = vmatpush3.bf16.xpose.msra.mxu0 %v541_v10 }
  0x4c   : > { %517 = vmatprep.subr.bf16.mxu0 %v553_v1 }
  0x8a   : > { %v243_v12 = vpop.permute.xlu0 %242 }
  0x8b   : > { %v250_v16 = vmul.f32 %v487_v13, %v243_v12 }
  0x8e   : > { %v248_v15 = vpop.permute.xlu0 %247 }
  0x8f   : > { %v251_v17 = vmul.f32 %v488_v14, %v248_v15 }
  0x91   : > { %v492_v18 = vpack.c.bf16 %v251_v17, %v250_v16 }
  0x93   : > { %493 = vst [vmem:[#allocation2] sm:$0xff] %v492_v18  }
  0x9a   : > { %v542_v19 = vld [vmem:[#allocation2] sm:$0xff]  }
  0x9b   : > { %518 = vmatpush3.bf16.xpose.msra.mxu0 %v542_v19 }
  0xa2   : > { %520 = vmatmul.mubr.bf16.vlgmr.msra.gmra.mxu0 %v543_v20 }
 0x162   : > { %v368_v21 = vpop.f32.mrf.mxu0 }
 0x163   : > { %375 = vst [vmem:[%s216_s29] sm:$0xff] %v368_v21 }
 0x164   : > { %v521_v22 = vpop.f32.mrf.mxu0 }
 0x166   : > { %v371_v23 = vpop.f32.mrf.mxu0 }
 0x167   : > { %376 = vst [vmem:[%s216_s29 + $0x8] sm:$0xff] %v371_v23 }
 0x168   : > { %v522_v24 = vpop.f32.mrf.mxu0 }
 0x169 PF: > { %s13_s12 = sadd.s32 1, %s550_s12  }
 0x16a   : > { %p10_p5 = scmp.ge.s32.totalorder %s13_s12, 4  }
 0x16c   :  { %12 = sbr.rel (!%p10_p5) target bundleno = 1 (0x1), region = 68 }

// kernel: _track_head_forward.2
= control target key start
LH: loop header
LB: loop body
LE: loop exit
PB: predicated region body
PF: predicated region fallthrough
CT: control target
= control target key end

     0   :  { %s1004_s18 = smov 0   ;;  %s1006_s19 = smov 0   ;;  %s1149_s0 = inlined_call_operand.vmem [shape: bf16[64,256], index: 0, kind: input, shape index: {}]   ;;  %s1150_s1 = inlined_call_operand.vmem [shape: bf16[256,128], index: 1, kind: input, shape index: {}]   ;;  %s1151_s2 = inlined_call_operand.vmem [shape: f32[1,128], index: 2, kind: input, shape index: {}]   ;;  %s1152_s3 = inlined_call_operand.vmem [shape: bf16[128,128], index: 3, kind: input, shape index: {}]   ;;  %s1153_s4 = inlined_call_operand.vmem [shape: f32[1,128], index: 4, kind: input, shape index: {}]   ;;  %s1154_s5 = inlined_call_operand.vmem [shape: bf16[64,128], index: 5, kind: output, shape index: {}]  }
   0x1   :  { %s1008_s20 = smov 0   ;;  %s1010_s21 = smov 0  }
   0x2   :  { %s1012_s22 = smov 0   ;;  %s1014_s23 = smov 0  }
   0x3   :  { %s1016_s24 = smov 0  }
   0x4 LB: > { %s24_s25 = sadd.s32 1, %s963_s22  ;;  %s27_s26 = sadd.s32 1, %s967_s23  ;;  %s971_s24 = sphi %s1016_s24, %s15_s24   ;;  %s967_s23 = sphi %s1014_s23, %s1160_s23   ;;  %s963_s22 = sphi %s1012_s22, %s1159_s22   ;;  %s959_s21 = sphi %s1010_s21, %s1158_s21   ;;  %s955_s20 = sphi %s1008_s20, %s1157_s20   ;;  %s951_s19 = sphi %s1006_s19, %s1156_s19   ;;  %s947_s18 = sphi %s1004_s18, %s1155_s18  }
   0x5   : > { %p25_p0 = scmp.ge.s32.totalorder %s24_s25, 2  ;;  %p43_p1 = scmp.ne.s32.totalorder %s951_s19, %s947_s18 }
   0x6   : > { %p44_p2 = scmp.eq.s32.totalorder %s971_s24, 0  ;;  %s36_s30 = sadd.s32 1, %s951_s19 }
   0x7   : > { %s1162_s25 = smov (%p25_p0, %s24_s25), 0  ;;  %s1164_s26 = smov (!%p25_p0, %s27_s26), %s967_s23 }
   0x8   : > { %p45_p3 = por %p44_p2, %p43_p1  ;;  %p29_p4 = scmp.ge.s32.totalorder %s1164_s26, 2 }
   0x9   : > { %s32_s27 = ssub.s32 %s963_s22, %s1162_s25  ;;  %p727_p6 = scmp.ge.s32.totalorder %s971_s24, 4 }
   0xa   : > { %s1166_s26 = smov (%p29_p4, %s1164_s26), 0 }
   0xb   : > { %s31_s28 = ssub.s32 %s967_s23, %s1166_s26  ;;  %193 = sbr.rel (%p727_p6) target bundleno = 24 (0x18), region = 28 }
   0xc   : > { %s33_s29 = sor.u32 %s32_s27, %s31_s28 }
   0xd   : > { %p34_p5 = scmp.eq.s32.totalorder %s33_s29, 0 }
   0xf   : > { %s1055_s6 = scalar_select %p34_p5, %s951_s19, %s36_s30  }
  0x10   : > { %196 = sbr.rel (!%p45_p3) target bundleno = 24 (0x18), region = 32  ;;  %s198_s7 = sand.u32 (%p45_p3), 1, %s951_s19  }
  0x11   : > { %s766_s8 = sshll.u32 (%p45_p3), %s967_s23, 3  ;;  %s728_s9 = sshll.u32 (%p45_p3), %s198_s7, 4 }
  0x12   : > { %s203_s10 = sadd.s32 (%p45_p3), %s963_s22, %s766_s8  ;;  %s200_s15 = scalar_lea.vmem (%p45_p3), [#allocation3], %s728_s9 }
  0x13   : > { %s731_s11 = sshll.u32 (%p45_p3), %s203_s10, 2 }
  0x14   : > { %s205_s14 = scalar_lea.vmem (%p45_p3), %s1149_s0, %s731_s11 }
  0x15   : > { %v222_v0 = vld [vmem:[%s205_s14] sm:$0xf]  ;;  %v224_v1 = vld [vmem:[%s205_s14 + $0x8] sm:$0xf]  ;;  %v226_v2 = vld [vmem:[%s205_s14 + $0x10] sm:$0xf] }
  0x16   : > { %223 = vst [vmem:[%s200_s15] sm:$0xf] %v222_v0  ;;  %225 = vst [vmem:[%s200_s15 + $0x4] sm:$0xf] %v224_v1  ;;  %v228_v3 = vld [vmem:[%s205_s14 + $0x18] sm:$0xf] }
  0x17   : > { %227 = vst [vmem:[%s200_s15 + $0x8] sm:$0xf] %v226_v2  ;;  %229 = vst [vmem:[%s200_s15 + $0xc] sm:$0xf] %v228_v3 }
  0x18 PF: > { %p732_p7 = scmp.ge.s32.totalorder %s971_s24, 1  ;;  %p269_p8 = scmp.lt.s32.totalorder %s971_s24, 5 }
  0x1a   : > { %p270_p9 = pnand %p732_p7, %p269_p8 }
  0x1b   : > { %s276_s16 = sand.u32 (!%p270_p9), 1, %s947_s18   ;;  %s734_s17 = sshll.u32 (!%p270_p9), %s955_s20, 4 }
  0x1c   : > { %273 = sbr.rel (%p270_p9) target bundleno = 516 (0x204), region = 77  ;;  %s1068_s27 = sshll.u32 (!%p270_p9), %s276_s16, 4 }
  0x1d   : > { %p310_p10 = scmp.lt.s32.totalorder (!%p270_p9), %s734_s17, 31  ;;  %s736_s28 = sshll.u32 (!%p270_p9), %s959_s21, 2 }
  0x1e   : > { %p316_p11 = scmp.lt.s32.totalorder (!%p270_p9), %s736_s28, 7  ;;  %s278_s12 = scalar_lea.vmem (!%p270_p9), [#allocation3], %s1068_s27 }
  0x1f   : > { %p738_p12 = scmp.ne.s32.totalorder (!%p270_p9), %s955_s20, 0 }
  0x21   : > { %s1168_s17 = smov (!%p310_p10, %s734_s17), 31  ;;  %s1170_s28 = smov (!%p316_p11, %s736_s28), 7 }
  0x22   : > { %s735_s29 = sshll.u32 %s1168_s17, 2  ;;  %s737_s9 = sshll.u32 %s1170_s28, 2 }
  0x23   : > { %s1074_s8 = scalar_lea.vmem %s1150_s1, %s735_s29  ;;  %s1079_s18 = scalar_lea.vmem %s1154_s5, %s737_s9 }
  0x24   : > { %325 = sbr.rel (%p738_p12) target bundleno = 44 (0x2c), region = 85 }
  0x29   : > { %v973_v4 = vmov 0.0  }
  0x2a   : > { %326 = vst [vmem:[#allocation2 + $0x10] sm:$0xff] %v973_v4  ;;  %327 = vst [vmem:[#allocation2] sm:$0xff] %v973_v4 }
  0x2b   : > { %328 = vst [vmem:[#allocation2 + $0x18] sm:$0xff] %v973_v4  ;;  %329 = vst [vmem:[#allocation2 + $0x8] sm:$0xff] %v973_v4 }
  0x2c PF: > { %v899_v5 = vld [vmem:[%s1074_s8 + $0x38] sm:$0xff]   ;;  %v900_v6 = vld [vmem:[%s1074_s8 + $0x30] sm:$0xff]   ;;  %v901_v7 = vld [vmem:[%s1074_s8 + $0x28] sm:$0xff]   ;;  %p749_p13 = scmp.ne.s32.totalorder %s955_s20, 1 }
  0x2d   : > { %802 = vmatprep.subr.bf16.mxu0 %v899_v5  ;;  %v902_v8 = vld [vmem:[%s1074_s8 + $0x20] sm:$0xff]   ;;  %v903_v10 = vld [vmem:[%s1074_s8 + $0x18] sm:$0xff]   ;;  %v904_v11 = vld [vmem:[%s1074_s8 + $0x10] sm:$0xff]  }
  0x2e   : > { %803 = vmatpush3.bf16.msra.mxu0 %v899_v5  ;;  %v907_v9 = vld [vmem:[%s278_s12] sm:$0xff]   ;;  %v905_v12 = vld [vmem:[%s1074_s8 + $0x8] sm:$0xff]  }
  0x2f   : > { %804 = vmatprep.subr.bf16.mxu0 %v900_v6  ;;  %818 = vmatprep.mubr.bf16.mxu0 %v907_v9  ;;  %v906_v13 = vld [vmem:[%s1074_s8] sm:$0xff]   ;;  %v908_v14 = vld [vmem:[%s278_s12 + $0x8] sm:$0xff]  }
  0x31   : > { %v330_v17 = vld [vmem:[#allocation2 + $0x10] sm:$0xff]  ;;  %v331_v23 = vld [vmem:[#allocation2] sm:$0xff] }
  0x32   : > { %805 = vmatpush3.bf16.msra.mxu0 %v900_v6  ;;  %v332_v15 = vld [vmem:[#allocation2 + $0x18] sm:$0xff]  ;;  %v333_v20 = vld [vmem:[#allocation2 + $0x8] sm:$0xff] }
  0x33   : > { %806 = vmatprep.subr.bf16.mxu0 %v901_v7 }
  0x36   : > { %807 = vmatpush3.bf16.msra.mxu0 %v901_v7 }
  0x37   : > { %808 = vmatprep.subr.bf16.mxu0 %v902_v8 }
  0x3a   : > { %809 = vmatpush3.bf16.msra.mxu0 %v902_v8 }
  0x3b   : > { %810 = vmatprep.subr.bf16.mxu0 %v903_v10 }
  0x3e   : > { %811 = vmatpush3.bf16.msra.mxu0 %v903_v10 }
  0x3f   : > { %812 = vmatprep.subr.bf16.mxu0 %v904_v11 }
  0x42   : > { %813 = vmatpush3.bf16.msra.mxu0 %v904_v11 }
  0x43   : > { %814 = vmatprep.subr.bf16.mxu0 %v905_v12 }
  0x46   : > { %815 = vmatpush3.bf16.msra.mxu0 %v905_v12 }
  0x47   : > { %816 = vmatprep.subr.bf16.mxu0 %v906_v13 }
  0x4a   : > { %817 = vmatpush3.bf16.msra.mxu0 %v906_v13 }
  0x4d   : > { %819 = vmatmul.mubr.bf16.vlgmr.msra.gmra.mxu0 %v908_v14 }
 0x10d   : > { %v820_v16 = vpop.f32.mrf.mxu0 }
 0x10e   : > { %v465_v18 = vadd.f32 %v820_v16, %v332_v15 }
 0x10f   : > { %v448_v19 = vpop.f32.mrf.mxu0 }
 0x110   : > { %469 = vst [vmem:[#allocation2 + $0x18] sm:$0xff] %v465_v18  ;;  %v463_v21 = vadd.f32 %v448_v19, %v330_v17 }
 0x111   : > { %v821_v22 = vpop.f32.mrf.mxu0 }
 0x112   : > { %467 = vst [vmem:[#allocation2 + $0x10] sm:$0xff] %v463_v21  ;;  %v466_v24 = vadd.f32 %v821_v22, %v333_v20  ;;  %474 = sbr.rel (%p749_p13) target bundleno = 516 (0x204), region = 89 }
 0x113   : > { %v451_v25 = vpop.f32.mrf.mxu0 }
 0x114   : > { %470 = vst [vmem:[#allocation2 + $0x8] sm:$0xff] %v466_v24  ;;  %v464_v26 = vadd.f32 %v451_v25, %v331_v23 }
 0x116   : > { %468 = vst [vmem:[#allocation2] sm:$0xff] %v464_v26 }
 0x117   : > { %v909_v27 = vld [vmem:[%s1152_s3 + $0x38] sm:$0xff]   ;;  %v910_v28 = vld [vmem:[%s1152_s3 + $0x30] sm:$0xff]   ;;  %v911_v29 = vld [vmem:[%s1152_s3 + $0x28] sm:$0xff]  }
 0x118   : > { %822 = vmatprep.subr.bf16.mxu0 %v909_v27  ;;  %v912_v30 = vld [vmem:[%s1152_s3 + $0x20] sm:$0xff]   ;;  %v913_v38 = vld [vmem:[%s1152_s3 + $0x18] sm:$0xff]   ;;  %v914_v40 = vld [vmem:[%s1152_s3 + $0x10] sm:$0xff]  }
 0x119   : > { %823 = vmatpush3.bf16.msra.mxu0 %v909_v27  ;;  %v475_v31 = vld [vmem:[#allocation2 + $0x10] sm:$0xff]  ;;  %v750_v33 = vld [vmem:[%s1151_s2] ss:$0 sm:$0xff]  ;;  %v477_v41 = vld [vmem:[#allocation2 + $0x18] sm:$0xff] }
 0x11a   : > { %824 = vmatprep.subr.bf16.mxu0 %v910_v28  ;;  %v486_v34 = vadd.f32 %v750_v33, %v475_v31  ;;  %v915_v43 = vld [vmem:[%s1152_s3 + $0x8] sm:$0xff]   ;;  %v488_v44 = vadd.f32 %v750_v33, %v477_v41  ;;  %v916_v46 = vld [vmem:[%s1152_s3] sm:$0xff]  }
 0x11b   : > { %v478_v42 = vld [vmem:[#allocation2 + $0x8] sm:$0xff]  ;;  %v751_v53 = vld [vmem:[%s1153_s4] ss:$0 sm:$0xff] }
 0x11c   : > { %v490_v36 = vmax.f32 %v486_v34, 0.0  ;;  %v489_v45 = vadd.f32 %v750_v33, %v478_v42  ;;  %v492_v47 = vmax.f32 %v488_v44, 0.0 }
 0x11d   : > { %825 = vmatpush3.bf16.msra.mxu0 %v910_v28  ;;  %v476_v32 = vld [vmem:[#allocation2] sm:$0xff] }
 0x11e   : > { %826 = vmatprep.subr.bf16.mxu0 %v911_v29  ;;  %v487_v35 = vadd.f32 %v750_v33, %v476_v32  ;;  %v493_v48 = vmax.f32 %v489_v45, 0.0 }
 0x120   : > { %v491_v37 = vmax.f32 %v487_v35, 0.0  ;;  %v495_v49 = vpack.c.bf16 %v493_v48, %v492_v47 }
 0x121   : > { %827 = vmatpush3.bf16.msra.mxu0 %v911_v29 }
 0x122   : > { %828 = vmatprep.subr.bf16.mxu0 %v912_v30  ;;  %v494_v39 = vpack.c.bf16 %v491_v37, %v490_v36 }
 0x124   : > { %838 = vmatprep.mubr.bf16.mxu0 %v494_v39 }
 0x125   : > { %829 = vmatpush3.bf16.msra.mxu0 %v912_v30 }
 0x126   : > { %830 = vmatprep.subr.bf16.mxu0 %v913_v38 }
 0x129   : > { %831 = vmatpush3.bf16.msra.mxu0 %v913_v38 }
 0x12a   : > { %832 = vmatprep.subr.bf16.mxu0 %v914_v40 }
 0x12d   : > { %833 = vmatpush3.bf16.msra.mxu0 %v914_v40 }
 0x12e   : > { %834 = vmatprep.subr.bf16.mxu0 %v915_v43 }
 0x131   : > { %835 = vmatpush3.bf16.msra.mxu0 %v915_v43 }
 0x132   : > { %836 = vmatprep.subr.bf16.mxu0 %v916_v46 }
 0x135   : > { %837 = vmatpush3.bf16.msra.mxu0 %v916_v46 }
 0x138   : > { %839 = vmatmul.mubr.bf16.vlgmr.msra.gmra.mxu0 %v495_v49 }
 0x1f8   : > { %v840_v50 = vpop.f32.mrf.mxu0 }
 0x1f9   : > { %v610_v58 = vadd.f32 %v840_v50, %v751_v53 }
 0x1fa   : > { %v601_v51 = vpop.f32.mrf.mxu0 }
 0x1fb   : > { %v602_v56 = vadd.f32 %v751_v53, %v601_v51 }
 0x1fc   : > { %v841_v52 = vpop.f32.mrf.mxu0 }
 0x1fd   : > { %v613_v54 = vadd.f32 %v841_v52, %v751_v53 }
 0x1fe   : > { %v604_v55 = vpop.f32.mrf.mxu0 }
 0x1ff   : > { %v605_v57 = vadd.f32 %v751_v53, %v604_v55  ;;  %v779_v60 = vpack.c.bf16 %v613_v54, %v610_v58 }
 0x201   : > { %v774_v59 = vpack.c.bf16 %v605_v57, %v602_v56  ;;  %781 = vst [vmem:[%s1079_s18 + $0x8] sm:$0xff] %v779_v60  }
 0x203   : > { %775 = vst [vmem:[%s1079_s18] sm:$0xff] %v774_v59  }
 0x204 PF: > { %s15_s24 = sadd.s32 1, %s971_s24   ;;  %s1155_s18 = smov %s951_s19 }
 0x205   : > { %p12_p0 = scmp.ge.s32.totalorder %s15_s24, 6   ;;  %s1156_s19 = smov %s1055_s6 }
 0x206   : > { %s1157_s20 = smov %s963_s22  ;;  %s1158_s21 = smov %s967_s23 }
 0x207   : > { %s1159_s22 = smov %s1162_s25  ;;  %s1160_s23 = smov %s1166_s26 }
 0x208   :  { %14 = sbr.rel (!%p12_p0) target bundleno = 4 (0x4), region = 127 }

</bundles_post_ra>
